<compile_context>
chip_gen: v7x
topology: tpu7x:2x2x1
jax: 0.10.0
libtpu: 0.0.40
codegen_flags: <defaults>
</compile_context>

<pallas_src>
import jax
import jax.numpy as jnp
from jax.experimental import pallas as pl
from jax.experimental.pallas import tpu as pltpu

EMBED_DIM = 32
H1 = 512
H2 = 256
OUT = 1


def _round_up(n, m):
    return ((n + m - 1) // m) * m


def _pick_tile(B, tb_request):
    """Pick (tb_eff, B_pad): tb_eff is a multiple of 128 dividing B_pad, with
    B_pad = round_up(B, 128) (no over-padding), and >= 2 grid steps whenever
    the padded batch has >= 2 groups of 128 rows (v7x has 2 TensorCores)."""
    m = _round_up(B, 128) // 128                 # number of 128-row groups
    max_d = max(1, min(tb_request // 128, m))    # cap by requested tile size
    if m >= 2:
        max_d = max(1, min(max_d, m // 2))       # ensure >= 2 grid steps
    d = 1
    for cand in range(1, max_d + 1):             # largest divisor of m <= max_d
        if m % cand == 0:
            d = cand
    return d * 128, m * 128


def _reward_mlp_kernel(x_ref, w1_ref, b1_ref, w2_ref, b2_ref, w3_ref, b3_ref, o_ref):
    # Fused 3-layer MLP: weights use constant block indices so they are DMA'd
    # into VMEM once and stay resident; one batch tile per grid step.
    # x arrives in f32 straight from HBM; cast to bf16 here (VPU, cheap) so
    # the wrapper needs no separate cast pass over x.
    x = x_ref[...].astype(jnp.bfloat16)                              # (tb, D)

    # Layer 1: bf16 MXU matmul, f32 accumulation; bias + ReLU in f32, then
    # cast to bf16 *before* the (tb, 512) activation streams through VMEM.
    h1 = jnp.dot(x, w1_ref[...], preferred_element_type=jnp.float32) + b1_ref[...]
    h1 = jnp.maximum(h1, 0.0).astype(jnp.bfloat16)                   # ReLU (Dropout = id, eval)

    # Layer 2: bf16 MXU matmul, f32 accumulation; bias + ReLU in f32.
    h2 = jnp.dot(h1, w2_ref[...], preferred_element_type=jnp.float32) + b2_ref[...]
    h2 = jnp.maximum(h2, 0.0)                                        # ReLU (Dropout = id, eval)

    # Layer 3 (H2 -> 1) on the VPU/XLU: elementwise multiply + lane reduction,
    # full f32 (a (tb,256)x(256,1) matmul would waste a whole MXU pass).
    r = jnp.sum(h2 * w3_ref[...], axis=-1, keepdims=True) + b3_ref[...]   # (tb, 1)

    # Lane-dense store: write the per-example rewards as a (1, tb) row.
    o_ref[0] = jnp.transpose(r, (1, 0)).astype(o_ref.dtype)


def reward_model_forward(x, params, *, tb=512):
    """x: [B, D] float32 -> rewards [B, 1] float32 (eval-mode forward)."""
    w1, b1, w2, b2, w3, b3 = params
    B, D = x.shape

    tb_eff, B_pad = _pick_tile(B, int(tb))
    num_tiles = B_pad // tb_eff

    # x stays f32 (cast to bf16 happens inside the kernel); pad only if needed.
    x_in = x
    if B_pad != B:
        x_in = jnp.pad(x, ((0, B_pad - B), (0, 0)))   # pad rows sliced off below

    # One-time wrapper-side casts for the resident operands (not per grid step):
    # bf16 weights for the two big matmuls, f32 row-vector head, f32 biases.
    w1_bf = w1.astype(jnp.bfloat16)
    w2_bf = w2.astype(jnp.bfloat16)
    b1_f = b1.astype(jnp.float32).reshape(1, H1)
    b2_f = b2.astype(jnp.float32).reshape(1, H2)
    w3_row = w3.astype(jnp.float32).reshape(1, H2)       # hoisted (1, H2) row
    b3_2d = b3.astype(jnp.float32).reshape(1, 1)

    cost = pl.CostEstimate(
        flops=2 * B_pad * (D * H1 + H1 * H2 + H2),
        transcendentals=0,
        bytes_accessed=(B_pad * D * 4                     # x (f32)
                        + (D * H1 + H1 * H2) * 2          # w1, w2 (bf16)
                        + (H1 + H2 + H2 + 1) * 4          # b1, b2, w3_row, b3 (f32)
                        + B_pad * 4),                     # output (f32)
    )

    # Constant block index => DMA'd into VMEM once, no per-step re-fetch.
    const = lambda shape: pl.BlockSpec(shape, lambda i: (0, 0))

    out = pl.pallas_call(
        _reward_mlp_kernel,
        out_shape=jax.ShapeDtypeStruct((num_tiles, 1, tb_eff), jnp.float32),
        grid_spec=pltpu.PrefetchScalarGridSpec(
            num_scalar_prefetch=0,
            grid=(num_tiles,),
            in_specs=[
                pl.BlockSpec((tb_eff, D), lambda i: (i, 0)),   # x tile (f32)
                const((D, H1)),                                # w1 (bf16)
                const((1, H1)),                                # b1 (f32)
                const((H1, H2)),                               # w2 (bf16)
                const((1, H2)),                                # b2 (f32)
                const((1, H2)),                                # w3 row (f32)
                const((1, 1)),                                 # b3 (f32)
            ],
            out_specs=pl.BlockSpec((1, 1, tb_eff), lambda i: (i, 0, 0)),
        ),
        compiler_params=pltpu.CompilerParams(
            dimension_semantics=("parallel",),                 # batch tiles shard across TCs
        ),
        cost_estimate=cost,
    )(x_in, w1_bf, b1_f, w2_bf, b2_f, w3_row, b3_2d)

    # (num_tiles, 1, tb) -> (B_pad, 1) -> strip the pad rows.
    return out.reshape(B_pad, 1)[:B]


def init_params(key, embedding_dim=EMBED_DIM):
    """Deterministic init mirroring nn.Linear's U(-1/sqrt(fan_in), 1/sqrt(fan_in))."""
    ks = jax.random.split(key, 6)

    def lin(kw, kb, fan_in, fan_out):
        bound = 1.0 / jnp.sqrt(jnp.float32(fan_in))
        w = jax.random.uniform(kw, (fan_in, fan_out), jnp.float32, -bound, bound)
        b = jax.random.uniform(kb, (1, fan_out), jnp.float32, -bound, bound)
        return w, b

    w1, b1 = lin(ks[0], ks[1], embedding_dim, H1)
    w2, b2 = lin(ks[2], ks[3], H1, H2)
    w3, b3 = lin(ks[4], ks[5], H2, OUT)
    return (w1, b1, w2, b2, w3, b3)


def reward_model_reference(x, params):
    w1, b1, w2, b2, w3, b3 = params
    h1 = jnp.maximum(x @ w1 + b1, 0.0)
    h2 = jnp.maximum(h1 @ w2 + b2, 0.0)
    return h2 @ w3 + b3


if __name__ == "__main__":
    key = jax.random.PRNGKey(0)
    k_param, k_x = jax.random.split(key)

    B = 8  # small demo batch (padded to one 128-row tile inside the wrapper)
    params = init_params(k_param, EMBED_DIM)
    x = jax.random.normal(k_x, (B, EMBED_DIM), jnp.float32)

    out = reward_model_forward(x, params)
    out = jax.block_until_ready(out)

    ref = reward_model_reference(x, params)
    assert out.shape == (B, 1), f"bad output shape {out.shape}"
    # bf16 MXU inputs (and a bf16 h1) with f32 accumulation -> ~1e-3-level
    # deviations vs. the pure-f32 reference; 5e-2 tolerance is comfortably loose.
    assert jnp.allclose(out, ref, atol=5e-2, rtol=5e-2), "mismatch vs JAX reference"

    print("KERNEL_OK")
</pallas_src>

<mosaic_0001>
module attributes {stable_mosaic.version = 11 : i64} {
  func.func @_reward_mlp_kernel(%arg0: i32, %arg1: memref<128x32xf32, #tpu.memory_space<vmem>>, %arg2: memref<32x512xbf16, #tpu.memory_space<vmem>>, %arg3: memref<1x512xf32, #tpu.memory_space<vmem>>, %arg4: memref<512x256xbf16, #tpu.memory_space<vmem>>, %arg5: memref<1x256xf32, #tpu.memory_space<vmem>>, %arg6: memref<1x256xf32, #tpu.memory_space<vmem>>, %arg7: memref<1x1xf32, #tpu.memory_space<vmem>>, %arg8: memref<1x1x128xf32, #tpu.memory_space<vmem>>) attributes {dimension_semantics = [#tpu.dimension_semantics<parallel>], iteration_bounds = array<i64: 1>, scalar_prefetch = 0 : i64, scratch_operands = 0 : i64, tpu.core_type = #tpu.core_type<tc>, window_params = [{transform_indices = @transform_0, window_bounds = array<i64: 128, 32>}, {pipeline_mode = #tpu.pipeline_mode<synchronous>, transform_indices = @transform_1, window_bounds = array<i64: 32, 512>}, {pipeline_mode = #tpu.pipeline_mode<synchronous>, transform_indices = @transform_2, window_bounds = array<i64: 1, 512>}, {pipeline_mode = #tpu.pipeline_mode<synchronous>, transform_indices = @transform_3, window_bounds = array<i64: 512, 256>}, {pipeline_mode = #tpu.pipeline_mode<synchronous>, transform_indices = @transform_4, window_bounds = array<i64: 1, 256>}, {pipeline_mode = #tpu.pipeline_mode<synchronous>, transform_indices = @transform_5, window_bounds = array<i64: 1, 256>}, {pipeline_mode = #tpu.pipeline_mode<synchronous>, transform_indices = @transform_6, window_bounds = array<i64: 1, 1>}, {transform_indices = @transform_7, window_bounds = array<i64: 1, 1, 128>}]} {
    %c0 = arith.constant 0 : index
    %c0_0 = arith.constant 0 : index
    %0 = vector.load %arg1[%c0, %c0_0] : memref<128x32xf32, #tpu.memory_space<vmem>>, vector<128x32xf32>
    %1 = arith.truncf %0 : vector<128x32xf32> to vector<128x32xbf16>
    %c0_1 = arith.constant 0 : index
    %c0_2 = arith.constant 0 : index
    %2 = vector.load %arg2[%c0_1, %c0_2] : memref<32x512xbf16, #tpu.memory_space<vmem>>, vector<32x512xbf16>
    %cst = arith.constant dense<0.000000e+00> : vector<128x512xf32>
    %3 = tpu.matmul %1, %2, %cst {dimension_numbers = #tpu.dot_dimension_numbers<[1], [0], [0], [1], [0, 0, 1, 1], [], []>} : vector<128x32xbf16>, vector<32x512xbf16>, vector<128x512xf32> -> vector<128x512xf32>
    %c0_3 = arith.constant 0 : index
    %c0_4 = arith.constant 0 : index
    %4 = vector.load %arg3[%c0_3, %c0_4] : memref<1x512xf32, #tpu.memory_space<vmem>>, vector<1x512xf32>
    %5 = vector.broadcast %4 : vector<1x512xf32> to vector<128x512xf32>
    %6 = arith.addf %3, %5 : vector<128x512xf32>
    %cst_5 = arith.constant 0.000000e+00 : f32
    %7 = vector.broadcast %cst_5 : f32 to vector<128x512xf32>
    %8 = arith.maximumf %6, %7 : vector<128x512xf32>
    %9 = arith.truncf %8 : vector<128x512xf32> to vector<128x512xbf16>
    %c0_6 = arith.constant 0 : index
    %c0_7 = arith.constant 0 : index
    %10 = vector.load %arg4[%c0_6, %c0_7] : memref<512x256xbf16, #tpu.memory_space<vmem>>, vector<512x256xbf16>
    %cst_8 = arith.constant dense<0.000000e+00> : vector<128x256xf32>
    %11 = tpu.matmul %9, %10, %cst_8 {dimension_numbers = #tpu.dot_dimension_numbers<[1], [0], [0], [1], [0, 0, 1, 1], [], []>} : vector<128x512xbf16>, vector<512x256xbf16>, vector<128x256xf32> -> vector<128x256xf32>
    %c0_9 = arith.constant 0 : index
    %c0_10 = arith.constant 0 : index
    %12 = vector.load %arg5[%c0_9, %c0_10] : memref<1x256xf32, #tpu.memory_space<vmem>>, vector<1x256xf32>
    %13 = vector.broadcast %12 : vector<1x256xf32> to vector<128x256xf32>
    %14 = arith.addf %11, %13 : vector<128x256xf32>
    %cst_11 = arith.constant 0.000000e+00 : f32
    %15 = vector.broadcast %cst_11 : f32 to vector<128x256xf32>
    %16 = arith.maximumf %14, %15 : vector<128x256xf32>
    %c0_12 = arith.constant 0 : index
    %c0_13 = arith.constant 0 : index
    %17 = vector.load %arg6[%c0_12, %c0_13] : memref<1x256xf32, #tpu.memory_space<vmem>>, vector<1x256xf32>
    %18 = vector.broadcast %17 : vector<1x256xf32> to vector<128x256xf32>
    %19 = arith.mulf %16, %18 : vector<128x256xf32>
    %cst_14 = arith.constant dense<0.000000e+00> : vector<128xf32>
    %20 = vector.multi_reduction <add>, %19, %cst_14 [1] : vector<128x256xf32> to vector<128xf32>
    %21 = vector.shape_cast %20 : vector<128xf32> to vector<128x1xf32>
    %c0_15 = arith.constant 0 : index
    %c0_16 = arith.constant 0 : index
    %22 = vector.load %arg7[%c0_15, %c0_16] : memref<1x1xf32, #tpu.memory_space<vmem>>, vector<1x1xf32>
    %23 = vector.broadcast %22 : vector<1x1xf32> to vector<128x1xf32>
    %24 = arith.addf %21, %23 : vector<128x1xf32>
    %25 = tpu.transpose %24, [1, 0] : vector<128x1xf32> -> vector<1x128xf32>
    %c0_17 = arith.constant 0 : index
    %c0_18 = arith.constant 0 : index
    %c0_19 = arith.constant 0 : index
    %26 = vector.load %arg8[%c0_17, %c0_18, %c0_19] : memref<1x1x128xf32, #tpu.memory_space<vmem>>, vector<1x1x128xf32>
    %27 = vector.shape_cast %26 : vector<1x1x128xf32> to vector<1x128xf32>
    %28 = vector.shape_cast %25 : vector<1x128xf32> to vector<1x1x128xf32>
    tpu.vector_store %arg8[%c0_17, %c0_18, %c0_19], %28 {strides = array<i32>} : memref<1x1x128xf32, #tpu.memory_space<vmem>>, vector<1x1x128xf32>,
    return
  }
  func.func @transform_0(%arg0: i32) -> (i32, i32) {
    %c0_i32 = arith.constant 0 : i32
    %c0_i32_0 = arith.constant 0 : i32
    return %arg0, %c0_i32 : i32, i32
  }
  func.func @transform_1(%arg0: i32) -> (i32, i32) {
    %c0_i32 = arith.constant 0 : i32
    %c0_i32_0 = arith.constant 0 : i32
    %c0_i32_1 = arith.constant 0 : i32
    return %c0_i32, %c0_i32_0 : i32, i32
  }
  func.func @transform_2(%arg0: i32) -> (i32, i32) {
    %c0_i32 = arith.constant 0 : i32
    %c0_i32_0 = arith.constant 0 : i32
    %c0_i32_1 = arith.constant 0 : i32
    return %c0_i32, %c0_i32_0 : i32, i32
  }
  func.func @transform_3(%arg0: i32) -> (i32, i32) {
    %c0_i32 = arith.constant 0 : i32
    %c0_i32_0 = arith.constant 0 : i32
    %c0_i32_1 = arith.constant 0 : i32
    return %c0_i32, %c0_i32_0 : i32, i32
  }
  func.func @transform_4(%arg0: i32) -> (i32, i32) {
    %c0_i32 = arith.constant 0 : i32
    %c0_i32_0 = arith.constant 0 : i32
    %c0_i32_1 = arith.constant 0 : i32
    return %c0_i32, %c0_i32_0 : i32, i32
  }
  func.func @transform_5(%arg0: i32) -> (i32, i32) {
    %c0_i32 = arith.constant 0 : i32
    %c0_i32_0 = arith.constant 0 : i32
    %c0_i32_1 = arith.constant 0 : i32
    return %c0_i32, %c0_i32_0 : i32, i32
  }
  func.func @transform_6(%arg0: i32) -> (i32, i32) {
    %c0_i32 = arith.constant 0 : i32
    %c0_i32_0 = arith.constant 0 : i32
    %c0_i32_1 = arith.constant 0 : i32
    return %c0_i32, %c0_i32_0 : i32, i32
  }
  func.func @transform_7(%arg0: i32) -> (i32, i32, i32) {
    %c0_i32 = arith.constant 0 : i32
    %c0_i32_0 = arith.constant 0 : i32
    %c0_i32_1 = arith.constant 0 : i32
    return %arg0, %c0_i32, %c0_i32_0 : i32, i32, i32
  }
}

</mosaic_0001>

<bundles_post_ra>
// kernel: tpu_custom_call.1
= control target key start
LH: loop header
LB: loop body
LE: loop exit
PB: predicated region body
PF: predicated region fallthrough
CT: control target
= control target key end

     0   :  { %s1955_s0 = inlined_call_operand.vmem [shape: f32[128,32], index: 0, kind: input, shape index: {}]   ;;  %s1956_s1 = inlined_call_operand.vmem [shape: bf16[32,512], index: 1, kind: input, shape index: {}]   ;;  %s1957_s2 = inlined_call_operand.vmem [shape: f32[1,512], index: 2, kind: input, shape index: {}]   ;;  %s1958_s3 = inlined_call_operand.hbm [shape: bf16[512,256], index: 3, kind: input, shape index: {}]   ;;  %s1959_s4 = inlined_call_operand.vmem [shape: f32[1,256], index: 4, kind: input, shape index: {}]   ;;  %s1960_s5 = inlined_call_operand.vmem [shape: f32[1,256], index: 5, kind: input, shape index: {}]   ;;  %s1961_s6 = inlined_call_operand.<no memory space> [shape: f32[1,1], index: 6, kind: input, shape index: {}]   ;;  %s1962_s7 = inlined_call_operand.hbm [shape: f32[1,1,128], index: 7, kind: output, shape index: {}]  }
   0x1   :  { %v12_v0 = vstv %s1961_s6 }
   0x2   :  { %13 = vst [vmem:[#allocation2] sm:$0x1] %v12_v0 }
   0x3   :  { %14 = vsyncpa [#allocation4], 0 }
   0x4   :  { %15 = vsyncpa [#allocation5], 0  ;;  %s1616_s26 = smov [#allocation3]   ;;  %s1568_s30 = scalar_lea.hbm %s1958_s3, 8192 }
   0x5   :  { %s27_s27 = sshll.u32 %s1616_s26, 4  ;;  %p1569_p0 = scmp.ne.s32.totalorder %s1958_s3, %s1568_s30  ;;  %s28_s27 = int_to_ptr.vmem [resolvable:$true] %s27_s27 }
   0x6   :  { %p1572_p1 = scmp.lt.u32.totalorder %s1568_s30, %s1958_s3 }
   0x8   :  { %p1574_p2 = pnand %p1572_p1, %p1569_p0 }
   0xa   :  { %1577 = shalt.err (!%p1574_p2)
}
   0xb   :  { %s1578_s6 = scalar_lea.vmem %s28_s27, 8192  ;;  %p1583_p4 = scmp.lt.s32.totalorder %s28_s27, %s28_s27 }
   0xc   :  { %p1579_p3 = scmp.ne.s32.totalorder %s28_s27, %s1578_s6  ;;  %p1584_p5 = scmp.lt.s32.totalorder %s1578_s6, %s1578_s6 }
   0xe   :  { %p1585_p6 = por %p1584_p5, %p1583_p4 }
  0x10   :  { %p1586_p7 = pnand %p1585_p6, %p1579_p3 }
  0x12   :  { %1589 = shalt.err (!%p1586_p7)
}
  0x13   :  { %s1617_s12 = smov 128   ;;  %s1618_s13 = smov 8  }
  0x14   :  { %33 = dma.hbm_to_vmem [thread:$0]  %s1958_s3, 8192, %s28_s27, [#allocation4], %s1617_s12, %s1617_s12, %s1618_s13  }
  0x15   :  { %1612 = dma.done.wait [#allocation4], 8192  }
  0x16   :  { %1613 = vsyncadd [#allocation4], 4294959104  ;;  %v1619_v1 = vmov 0   ;;  %v1460_v2 = vld [vmem:[%s1956_s1 + $0x4] ss:$16 sps:$4 sm:$0xff]   ;;  %v45_v11 = vld [vmem:[%s1955_s0 + $0x8] sm:$0xff] }
  0x17   :  { %195 = vmatprep.mubr.bf16.mxu0 %v1619_v1  ;;  %308 = vmatprep.mubr.bf16.mxu1 %v1619_v1  ;;  %v1462_v3 = vld [vmem:[%s1956_s1 + $0xc] ss:$16 sps:$4 sm:$0xff]   ;;  %v1464_v4 = vld [vmem:[%s1956_s1] ss:$16 sps:$4 sm:$0xff]   ;;  %v1465_v5 = vld [vmem:[%s1956_s1 + $0x8] ss:$16 sps:$4 sm:$0xff]  }
  0x18   :  { %163 = vmatprep.subr.bf16.mxu0 %v1460_v2  ;;  %276 = vmatprep.subr.bf16.mxu1 %v1462_v3  ;;  %v1466_v6 = vld [vmem:[%s1956_s1 + $0x24] ss:$16 sps:$4 sm:$0xff]   ;;  %v1468_v7 = vld [vmem:[%s1956_s1 + $0x2c] ss:$16 sps:$4 sm:$0xff]   ;;  %v1470_v8 = vld [vmem:[%s1956_s1 + $0x20] ss:$16 sps:$4 sm:$0xff]  }
  0x19   :  { %164 = vmatpush1.bf16.msra.mxu0 %v1464_v4  ;;  %277 = vmatpush1.bf16.msra.mxu1 %v1465_v5  ;;  %v1471_v9 = vld [vmem:[%s1956_s1 + $0x28] ss:$16 sps:$4 sm:$0xff]   ;;  %v44_v10 = vld [vmem:[%s1955_s0] sm:$0xff]  ;;  %vm138_vm0 = vcmask 261120   ;;  %v46_v13 = vld [vmem:[%s1955_s0 + $0x10] sm:$0xff] }
  0x1a   :  { %165 = vmatprep.subr.bf16.mxu0 %v1466_v6  ;;  %278 = vmatprep.subr.bf16.mxu1 %v1468_v7  ;;  %v60_v12 = vpack.c.bf16 %v45_v11, %v44_v10  ;;  %v47_v14 = vld [vmem:[%s1955_s0 + $0x18] sm:$0xff]  ;;  %v1472_v15 = vld [vmem:[#allocation3] ss:$8 sps:$4 sm:$0xff]   ;;  %v1474_v16 = vld [vmem:[#allocation3 + $0x4] ss:$8 sps:$4 sm:$0xff]  }
  0x1b   :  { %v1475_v17 = vld [vmem:[#allocation3 + $0x100] ss:$8 sps:$4 sm:$0xff]   ;;  %v1477_v18 = vld [vmem:[#allocation3 + $0x104] ss:$8 sps:$4 sm:$0xff]   ;;  %v1478_v19 = vld [vmem:[#allocation3 + $0x10] ss:$8 sps:$4 sm:$0xff]   ;;  %v61_v21 = vpack.c.bf16 %v47_v14, %v46_v13 }
  0x1c   :  { %v1480_v20 = vld [vmem:[#allocation3 + $0x14] ss:$8 sps:$4 sm:$0xff]   ;;  %v1481_v23 = vld [vmem:[#allocation3 + $0x110] ss:$8 sps:$4 sm:$0xff]   ;;  %v1486_v24 = vld [vmem:[#allocation3 + $0x24] ss:$8 sps:$4 sm:$0xff]  }
  0x1d   :  { %166 = vmatpush1.bf16.msra.mxu0 %v1470_v8  ;;  %279 = vmatpush1.bf16.msra.mxu1 %v1471_v9  ;;  %v1483_v22 = vld [vmem:[#allocation3 + $0x114] ss:$8 sps:$4 sm:$0xff]   ;;  %v1484_v25 = vld [vmem:[#allocation3 + $0x20] ss:$8 sps:$4 sm:$0xff]   ;;  %v1489_v26 = vld [vmem:[#allocation3 + $0x124] ss:$8 sps:$4 sm:$0xff]  }
  0x1e   :  { %881 = vmatprep.subr.bf16.mxu1 %v1474_v16  ;;  %994 = vmatprep.subr.bf16.mxu0 %v1477_v18  ;;  %v48_v27 = vld [vmem:[%s1955_s0 + $0x20] sm:$0xff]  ;;  %v49_v29 = vld [vmem:[%s1955_s0 + $0x28] sm:$0xff]  ;;  %v1490_v31 = vld [vmem:[#allocation3 + $0x30] ss:$8 sps:$4 sm:$0xff]  }
  0x1f   :  { %v1492_v28 = vld [vmem:[#allocation3 + $0x34] ss:$8 sps:$4 sm:$0xff]   ;;  %v1487_v30 = vld [vmem:[#allocation3 + $0x120] ss:$8 sps:$4 sm:$0xff]   ;;  %v62_v33 = vpack.c.bf16 %v49_v29, %v48_v27  ;;  %v1493_v34 = vld [vmem:[#allocation3 + $0x130] ss:$8 sps:$4 sm:$0xff]  }
  0x20   :  { %1310 = vmatmul.mubr.msk.bf16.vlgmr.msra.gmra.mrb[0].mxu0 %vm138_vm0, %v60_v12  ;;  %1318 = vmatmul.mubr.msk.bf16.vlgmr.msra.gmra.mrb[0].mxu1 %vm138_vm0, %v60_v12  ;;  %v1495_v32 = vld [vmem:[#allocation3 + $0x134] ss:$8 sps:$4 sm:$0xff]   ;;  %v1498_v35 = vld [vmem:[#allocation3 + $0x44] ss:$8 sps:$4 sm:$0xff]   ;;  %v1496_v36 = vld [vmem:[#allocation3 + $0x40] ss:$8 sps:$4 sm:$0xff]  }
  0x21   :  { %205 = vmatprep.mubr.bf16.mxu0 %v1619_v1  ;;  %318 = vmatprep.mubr.bf16.mxu1 %v1619_v1  ;;  %v1501_v37 = vld [vmem:[#allocation3 + $0x144] ss:$8 sps:$4 sm:$0xff]   ;;  %v1504_v39 = vld [vmem:[#allocation3 + $0x54] ss:$8 sps:$4 sm:$0xff]   ;;  %v1499_v41 = vld [vmem:[#allocation3 + $0x140] ss:$8 sps:$4 sm:$0xff]  }
  0x22   :  { %882 = vmatpush1.bf16.msra.mxu1 %v1472_v15  ;;  %995 = vmatpush1.bf16.msra.mxu0 %v1475_v17  ;;  %v50_v38 = vld [vmem:[%s1955_s0 + $0x30] sm:$0xff]  ;;  %v51_v40 = vld [vmem:[%s1955_s0 + $0x38] sm:$0xff]  ;;  %v1508_v47 = vld [vmem:[#allocation3 + $0x60] ss:$8 sps:$4 sm:$0xff]  }
  0x23   :  { %883 = vmatprep.subr.bf16.mxu1 %v1480_v20  ;;  %996 = vmatprep.subr.bf16.mxu0 %v1483_v22  ;;  %v1502_v42 = vld [vmem:[#allocation3 + $0x50] ss:$8 sps:$4 sm:$0xff]   ;;  %v1507_v43 = vld [vmem:[#allocation3 + $0x154] ss:$8 sps:$4 sm:$0xff]   ;;  %v63_v44 = vpack.c.bf16 %v51_v40, %v50_v38  ;;  %v1510_v46 = vld [vmem:[#allocation3 + $0x64] ss:$8 sps:$4 sm:$0xff]  }
  0x24   :  { %v1505_v45 = vld [vmem:[#allocation3 + $0x150] ss:$8 sps:$4 sm:$0xff]   ;;  %v1513_v48 = vld [vmem:[#allocation3 + $0x164] ss:$8 sps:$4 sm:$0xff]   ;;  %v1516_v50 = vld [vmem:[#allocation3 + $0x74] ss:$8 sps:$4 sm:$0xff]  }
  0x25   :  { %v52_v49 = vld [vmem:[%s1955_s0 + $0x40] sm:$0xff]  ;;  %v53_v51 = vld [vmem:[%s1955_s0 + $0x48] sm:$0xff]  ;;  %v1514_v53 = vld [vmem:[#allocation3 + $0x70] ss:$8 sps:$4 sm:$0xff]  }
  0x26   :  { %884 = vmatpush1.bf16.msra.mxu1 %v1478_v19  ;;  %997 = vmatpush1.bf16.msra.mxu0 %v1481_v23  ;;  %v1511_v52 = vld [vmem:[#allocation3 + $0x160] ss:$8 sps:$4 sm:$0xff]   ;;  %v1519_v54 = vld [vmem:[#allocation3 + $0x174] ss:$8 sps:$4 sm:$0xff]   ;;  %v64_v55 = vpack.c.bf16 %v53_v51, %v52_v49  ;;  %v1517_v56 = vld [vmem:[#allocation3 + $0x170] ss:$8 sps:$4 sm:$0xff]  }
  0x27   :  { %885 = vmatprep.subr.bf16.mxu1 %v1486_v24  ;;  %998 = vmatprep.subr.bf16.mxu0 %v1489_v26  ;;  %v1522_v57 = vld [vmem:[#allocation3 + $0x84] ss:$8 sps:$4 sm:$0xff]   ;;  %v1520_v58 = vld [vmem:[#allocation3 + $0x80] ss:$8 sps:$4 sm:$0xff]   ;;  %v1528_v61 = vld [vmem:[#allocation3 + $0x94] ss:$8 sps:$4 sm:$0xff]  }
  0x28   :  { %1311 = vmatmul.mubr.msk.bf16.gmra.mrb[4].mxu0 %vm138_vm0, %v61_v21  ;;  %1319 = vmatmul.mubr.msk.bf16.gmra.mrb[4].mxu1 %vm138_vm0, %v61_v21  ;;  %v1525_v59 = vld [vmem:[#allocation3 + $0x184] ss:$8 sps:$4 sm:$0xff]   ;;  %v55_v62 = vld [vmem:[%s1955_s0 + $0x58] sm:$0xff]  ;;  %v1523_v63 = vld [vmem:[#allocation3 + $0x180] ss:$8 sps:$4 sm:$0xff]  }
  0x29   :  { %215 = vmatprep.mubr.bf16.mxu0 %v1619_v1  ;;  %328 = vmatprep.mubr.bf16.mxu1 %v1619_v1  ;;  %v54_v60 = vld [vmem:[%s1955_s0 + $0x50] sm:$0xff]  ;;  %v1532_v6 = vld [vmem:[#allocation3 + $0xa0] ss:$8 sps:$4 sm:$0xff]   ;;  %v59_v21 = vld [vmem:[%s1955_s0 + $0x78] sm:$0xff] }
  0x2a   :  { %886 = vmatpush1.bf16.msra.mxu1 %v1484_v25  ;;  %999 = vmatpush1.bf16.msra.mxu0 %v1487_v30  ;;  %v1526_v0 = vld [vmem:[#allocation3 + $0x90] ss:$8 sps:$4 sm:$0xff]   ;;  %v1531_v2 = vld [vmem:[#allocation3 + $0x194] ss:$8 sps:$4 sm:$0xff]   ;;  %v65_v3 = vpack.c.bf16 %v55_v62, %v54_v60  ;;  %v1534_v5 = vld [vmem:[#allocation3 + $0xa4] ss:$8 sps:$4 sm:$0xff]  }
  0x2b   :  { %887 = vmatprep.subr.bf16.mxu1 %v1492_v28  ;;  %1000 = vmatprep.subr.bf16.mxu0 %v1495_v32  ;;  %v1529_v4 = vld [vmem:[#allocation3 + $0x190] ss:$8 sps:$4 sm:$0xff]   ;;  %v1537_v7 = vld [vmem:[#allocation3 + $0x1a4] ss:$8 sps:$4 sm:$0xff]   ;;  %v1540_v8 = vld [vmem:[#allocation3 + $0xb4] ss:$8 sps:$4 sm:$0xff]  }
  0x2c   :  { %v56_v9 = vld [vmem:[%s1955_s0 + $0x60] sm:$0xff]  ;;  %v57_v10 = vld [vmem:[%s1955_s0 + $0x68] sm:$0xff]  ;;  %v1538_v12 = vld [vmem:[#allocation3 + $0xb0] ss:$8 sps:$4 sm:$0xff]  }
  0x2d   :  { %v1535_v11 = vld [vmem:[#allocation3 + $0x1a0] ss:$8 sps:$4 sm:$0xff]   ;;  %v1543_v13 = vld [vmem:[#allocation3 + $0x1b4] ss:$8 sps:$4 sm:$0xff]   ;;  %v66_v14 = vpack.c.bf16 %v57_v10, %v56_v9  ;;  %v1541_v15 = vld [vmem:[#allocation3 + $0x1b0] ss:$8 sps:$4 sm:$0xff]  }
  0x2e   :  { %888 = vmatpush1.bf16.msra.mxu1 %v1490_v31  ;;  %1001 = vmatpush1.bf16.msra.mxu0 %v1493_v34  ;;  %v1546_v16 = vld [vmem:[#allocation3 + $0xc4] ss:$8 sps:$4 sm:$0xff]   ;;  %v1544_v17 = vld [vmem:[#allocation3 + $0xc0] ss:$8 sps:$4 sm:$0xff]   ;;  %v1552_v19 = vld [vmem:[#allocation3 + $0xd4] ss:$8 sps:$4 sm:$0xff]   ;;  %v78_v34 = vlaneseq }
  0x2f   :  { %889 = vmatprep.subr.bf16.mxu1 %v1498_v35  ;;  %1002 = vmatprep.subr.bf16.mxu0 %v1501_v37  ;;  %v1549_v18 = vld [vmem:[#allocation3 + $0x1c4] ss:$8 sps:$4 sm:$0xff]   ;;  %v1547_v22 = vld [vmem:[#allocation3 + $0x1c0] ss:$8 sps:$4 sm:$0xff]   ;;  %v1550_v23 = vld [vmem:[#allocation3 + $0xd0] ss:$8 sps:$4 sm:$0xff]  }
  0x30   :  { %1312 = vmatmul.mubr.msk.bf16.gmra.mrb[8].mxu0 %vm138_vm0, %v62_v33  ;;  %1320 = vmatmul.mubr.msk.bf16.gmra.mrb[8].mxu1 %vm138_vm0, %v62_v33  ;;  %v58_v20 = vld [vmem:[%s1955_s0 + $0x70] sm:$0xff]  ;;  %v1556_v28 = vld [vmem:[#allocation3 + $0xe0] ss:$8 sps:$4 sm:$0xff]   ;;  %v79_v35 = vshrl.u32 %v78_v34, 7 }
  0x31   :  { %225 = vmatprep.mubr.bf16.mxu0 %v1619_v1  ;;  %338 = vmatprep.mubr.bf16.mxu1 %v1619_v1  ;;  %v1555_v24 = vld [vmem:[#allocation3 + $0x1d4] ss:$8 sps:$4 sm:$0xff]   ;;  %v67_v25 = vpack.c.bf16 %v59_v21, %v58_v20  ;;  %v1553_v26 = vld [vmem:[#allocation3 + $0x1d0] ss:$8 sps:$4 sm:$0xff]   ;;  %v1561_v27 = vld [vmem:[#allocation3 + $0x1e4] ss:$8 sps:$4 sm:$0xff]  }
  0x32   :  { %890 = vmatpush1.bf16.msra.mxu1 %v1496_v36  ;;  %1003 = vmatpush1.bf16.msra.mxu0 %v1499_v41  ;;  %v1559_v29 = vld [vmem:[#allocation3 + $0x1e0] ss:$8 sps:$4 sm:$0xff]   ;;  %v1564_v30 = vld [vmem:[#allocation3 + $0xf4] ss:$8 sps:$4 sm:$0xff]   ;;  %v1562_v32 = vld [vmem:[#allocation3 + $0xf0] ss:$8 sps:$4 sm:$0xff]  }
  0x33   :  { %891 = vmatprep.subr.bf16.mxu1 %v1504_v39  ;;  %1004 = vmatprep.subr.bf16.mxu0 %v1507_v43  ;;  %v1567_v31 = vld [vmem:[#allocation3 + $0x1f4] ss:$8 sps:$4 sm:$0xff]   ;;  %v1565_v33 = vld [vmem:[#allocation3 + $0x1f0] ss:$8 sps:$4 sm:$0xff]   ;;  %v1780_v36 = vsub.s32 0, %v79_v35  ;;  %v88_v37 = vsub.s32 2, %v79_v35 }
  0x34   :  { %v76_v38 = vld [vmem:[%s1957_s2] sm:$0xf]  ;;  %v1785_v39 = vsub.s32 1, %v79_v35  ;;  %v92_v40 = vsub.s32 3, %v79_v35 }
  0x35   :  { %v1788_v41 = vrot.slane %v76_v38, %v1780_v36 }
  0x36   :  { %892 = vmatpush1.bf16.msra.mxu1 %v1502_v42  ;;  %1005 = vmatpush1.bf16.msra.mxu0 %v1505_v45  ;;  %v1790_v42 = vrot.slane %v76_v38, %v88_v37  ;;  %v1793_v43 = vrot.slane %v76_v38, %v1785_v39 }
  0x37   :  { %893 = vmatprep.subr.bf16.mxu1 %v1510_v46  ;;  %1006 = vmatprep.subr.bf16.mxu0 %v1513_v48 }
  0x38   :  { %1313 = vmatmul.mubr.msk.bf16.gmra.mrb[12].mxu0 %vm138_vm0, %v63_v44  ;;  %1321 = vmatmul.mubr.msk.bf16.gmra.mrb[12].mxu1 %vm138_vm0, %v63_v44  ;;  %v1795_v44 = vrot.slane %v76_v38, %v92_v40 }
  0x39   :  { %235 = vmatprep.mubr.bf16.mxu0 %v1619_v1  ;;  %348 = vmatprep.mubr.bf16.mxu1 %v1619_v1 }
  0x3a   :  { %894 = vmatpush1.bf16.msra.mxu1 %v1508_v47  ;;  %1007 = vmatpush1.bf16.msra.mxu0 %v1511_v52 }
  0x3b   :  { %895 = vmatprep.subr.bf16.mxu1 %v1516_v50  ;;  %1008 = vmatprep.subr.bf16.mxu0 %v1519_v54 }
  0x3e   :  { %896 = vmatpush1.bf16.msra.mxu1 %v1514_v53  ;;  %1009 = vmatpush1.bf16.msra.mxu0 %v1517_v56 }
  0x3f   :  { %897 = vmatprep.subr.bf16.mxu1 %v1522_v57  ;;  %1010 = vmatprep.subr.bf16.mxu0 %v1525_v59 }
  0x40   :  { %1314 = vmatmul.mubr.msk.bf16.gmra.mrb[16].mxu0 %vm138_vm0, %v64_v55  ;;  %1322 = vmatmul.mubr.msk.bf16.gmra.mrb[16].mxu1 %vm138_vm0, %v64_v55 }
  0x41   :  { %245 = vmatprep.mubr.bf16.mxu0 %v1619_v1  ;;  %358 = vmatprep.mubr.bf16.mxu1 %v1619_v1 }
  0x42   :  { %898 = vmatpush1.bf16.msra.mxu1 %v1520_v58  ;;  %1011 = vmatpush1.bf16.msra.mxu0 %v1523_v63 }
  0x43   :  { %899 = vmatprep.subr.bf16.mxu1 %v1528_v61  ;;  %1012 = vmatprep.subr.bf16.mxu0 %v1531_v2 }
  0x46   :  { %900 = vmatpush1.bf16.msra.mxu1 %v1526_v0  ;;  %1013 = vmatpush1.bf16.msra.mxu0 %v1529_v4 }
  0x47   :  { %901 = vmatprep.subr.bf16.mxu1 %v1534_v5  ;;  %1014 = vmatprep.subr.bf16.mxu0 %v1537_v7 }
  0x48   :  { %1315 = vmatmul.mubr.msk.bf16.gmra.mrb[20].mxu0 %vm138_vm0, %v65_v3  ;;  %1323 = vmatmul.mubr.msk.bf16.gmra.mrb[20].mxu1 %vm138_vm0, %v65_v3 }
  0x49   :  { %255 = vmatprep.mubr.bf16.mxu0 %v1619_v1  ;;  %368 = vmatprep.mubr.bf16.mxu1 %v1619_v1 }
  0x4a   :  { %902 = vmatpush1.bf16.msra.mxu1 %v1532_v6  ;;  %1015 = vmatpush1.bf16.msra.mxu0 %v1535_v11 }
  0x4b   :  { %903 = vmatprep.subr.bf16.mxu1 %v1540_v8  ;;  %1016 = vmatprep.subr.bf16.mxu0 %v1543_v13 }
  0x4e   :  { %904 = vmatpush1.bf16.msra.mxu1 %v1538_v12  ;;  %1017 = vmatpush1.bf16.msra.mxu0 %v1541_v15 }
  0x4f   :  { %905 = vmatprep.subr.bf16.mxu1 %v1546_v16  ;;  %1018 = vmatprep.subr.bf16.mxu0 %v1549_v18 }
  0x50   :  { %1316 = vmatmul.mubr.msk.bf16.gmra.mrb[24].mxu0 %vm138_vm0, %v66_v14  ;;  %1324 = vmatmul.mubr.msk.bf16.gmra.mrb[24].mxu1 %vm138_vm0, %v66_v14 }
  0x51   :  { %265 = vmatprep.mubr.bf16.mxu0 %v1619_v1  ;;  %378 = vmatprep.mubr.bf16.mxu1 %v1619_v1  ;;  %v1558_v1 = vld [vmem:[#allocation3 + $0xe4] ss:$8 sps:$4 sm:$0xff]  }
  0x52   :  { %906 = vmatpush1.bf16.msra.mxu1 %v1544_v17  ;;  %1019 = vmatpush1.bf16.msra.mxu0 %v1547_v22 }
  0x53   :  { %907 = vmatprep.subr.bf16.mxu1 %v1552_v19  ;;  %1020 = vmatprep.subr.bf16.mxu0 %v1555_v24 }
  0x56   :  { %908 = vmatpush1.bf16.msra.mxu1 %v1550_v23  ;;  %1021 = vmatpush1.bf16.msra.mxu0 %v1553_v26 }
  0x57   :  { %909 = vmatprep.subr.bf16.mxu1 %v1558_v1  ;;  %1022 = vmatprep.subr.bf16.mxu0 %v1561_v27 }
  0x58   :  { %1317 = vmatmul.mubr.msk.bf16.gmra.mrb[28].mxu0 %vm138_vm0, %v67_v25  ;;  %1325 = vmatmul.mubr.msk.bf16.gmra.mrb[28].mxu1 %vm138_vm0, %v67_v25 }
  0x5a   :  { %910 = vmatpush1.bf16.msra.mxu1 %v1556_v28  ;;  %1023 = vmatpush1.bf16.msra.mxu0 %v1559_v29 }
  0x5b   :  { %911 = vmatprep.subr.bf16.mxu1 %v1564_v30  ;;  %1024 = vmatprep.subr.bf16.mxu0 %v1567_v31 }
  0x5e   :  { %912 = vmatpush1.bf16.msra.mxu1 %v1562_v32  ;;  %1025 = vmatpush1.bf16.msra.mxu0 %v1565_v33 }
  0xf3   :  { %v197_v45 = vpop.f32.mrb[0].mxu0  ;;  %v310_v46 = vpop.f32.mrb[0].mxu1 }
  0xf4   :  { %v198_v47 = vadd.f32 %v197_v45, %v1788_v41  ;;  %v311_v48 = vadd.f32 %v310_v46, %v1790_v42  ;;  %v199_v49 = vpop.f32.mrb[1].mxu0  ;;  %v312_v50 = vpop.f32.mrb[1].mxu1 }
  0xf5   :  { %v200_v51 = vadd.f32 %v199_v49, %v1793_v43  ;;  %v313_v52 = vadd.f32 %v312_v50, %v1795_v44  ;;  %v201_v53 = vpop.f32.mrb[2].mxu0  ;;  %v314_v54 = vpop.f32.mrb[2].mxu1 }
  0xf6   :  { %v391_v55 = vmax.f32 %v311_v48, 0.0  ;;  %v202_v56 = vadd.f32 %v201_v53, %v1788_v41  ;;  %v315_v57 = vadd.f32 %v314_v54, %v1790_v42  ;;  %v203_v58 = vpop.f32.mrb[3].mxu0  ;;  %v316_v59 = vpop.f32.mrb[3].mxu1  ;;  %v389_v63 = vmax.f32 %v198_v47, 0.0 }
  0xf7   :  { %v392_v60 = vmax.f32 %v313_v52, 0.0  ;;  %v204_v61 = vadd.f32 %v203_v58, %v1793_v43  ;;  %v317_v62 = vadd.f32 %v316_v59, %v1795_v44  ;;  %v390_v3 = vmax.f32 %v200_v51, 0.0 }
  0xf8   :  { %v393_v0 = vmax.f32 %v202_v56, 0.0  ;;  %v395_v2 = vmax.f32 %v315_v57, 0.0 }
  0xf9   :  { %v394_v4 = vmax.f32 %v204_v61, 0.0  ;;  %v396_v5 = vmax.f32 %v317_v62, 0.0 }
  0xfa   :  { %v453_v6 = vpack.c.bf16 %v393_v0, %v389_v63  ;;  %v455_v7 = vpack.c.bf16 %v395_v2, %v391_v55 }
  0xfb   :  { %v454_v8 = vpack.c.bf16 %v394_v4, %v390_v3  ;;  %v456_v9 = vpack.c.bf16 %v396_v5, %v392_v60  ;;  %v207_v10 = vpop.f32.mrb[4].mxu0  ;;  %v320_v11 = vpop.f32.mrb[4].mxu1 }
  0xfc   :  { %v208_v12 = vadd.f32 %v207_v10, %v1788_v41  ;;  %v321_v13 = vadd.f32 %v320_v11, %v1790_v42  ;;  %v209_v14 = vpop.f32.mrb[5].mxu0  ;;  %v322_v15 = vpop.f32.mrb[5].mxu1 }
  0xfd   :  { %v210_v16 = vadd.f32 %v209_v14, %v1793_v43  ;;  %v323_v17 = vadd.f32 %v322_v15, %v1795_v44  ;;  %v211_v18 = vpop.f32.mrb[6].mxu0  ;;  %v324_v19 = vpop.f32.mrb[6].mxu1  ;;  %913 = vmatprep.mubr.bf16.mxu1 %v454_v8  ;;  %1026 = vmatprep.mubr.bf16.mxu0 %v456_v9 }
  0xfe   :  { %v399_v20 = vmax.f32 %v321_v13, 0.0  ;;  %v212_v21 = vadd.f32 %v211_v18, %v1788_v41  ;;  %v325_v22 = vadd.f32 %v324_v19, %v1790_v42  ;;  %v213_v23 = vpop.f32.mrb[7].mxu0  ;;  %v326_v24 = vpop.f32.mrb[7].mxu1  ;;  %914 = vmatmul.mubr.bf16.vlgmr.msra.gmra.mrb[32].mxu1 %v453_v6  ;;  %1027 = vmatmul.mubr.bf16.vlgmr.msra.gmra.mrb[32].mxu0 %v455_v7  ;;  %v397_v27 = vmax.f32 %v208_v12, 0.0 }
  0xff   :  { %v400_v25 = vmax.f32 %v323_v17, 0.0  ;;  %v214_v26 = vadd.f32 %v213_v23, %v1793_v43  ;;  %v327_v1 = vadd.f32 %v326_v24, %v1795_v44  ;;  %v398_v30 = vmax.f32 %v210_v16, 0.0 }
 0x100   :  { %v401_v28 = vmax.f32 %v212_v21, 0.0  ;;  %v403_v29 = vmax.f32 %v325_v22, 0.0 }
 0x101   :  { %v402_v31 = vmax.f32 %v214_v26, 0.0  ;;  %v404_v32 = vmax.f32 %v327_v1, 0.0 }
 0x102   :  { %v457_v33 = vpack.c.bf16 %v401_v28, %v397_v27  ;;  %v459_v34 = vpack.c.bf16 %v403_v29, %v399_v20 }
 0x103   :  { %v458_v35 = vpack.c.bf16 %v402_v31, %v398_v30  ;;  %v460_v37 = vpack.c.bf16 %v404_v32, %v400_v25  ;;  %v217_v38 = vpop.f32.mrb[8].mxu0  ;;  %v330_v40 = vpop.f32.mrb[8].mxu1 }
 0x104   :  { %v218_v45 = vadd.f32 %v217_v38, %v1788_v41  ;;  %v331_v46 = vadd.f32 %v330_v40, %v1790_v42  ;;  %v219_v47 = vpop.f32.mrb[9].mxu0  ;;  %v332_v48 = vpop.f32.mrb[9].mxu1 }
 0x105   :  { %v220_v49 = vadd.f32 %v219_v47, %v1793_v43  ;;  %v333_v50 = vadd.f32 %v332_v48, %v1795_v44  ;;  %v221_v51 = vpop.f32.mrb[10].mxu0  ;;  %v334_v52 = vpop.f32.mrb[10].mxu1  ;;  %923 = vmatprep.mubr.bf16.mxu1 %v458_v35  ;;  %1036 = vmatprep.mubr.bf16.mxu0 %v460_v37 }
 0x106   :  { %v407_v53 = vmax.f32 %v331_v46, 0.0  ;;  %v222_v54 = vadd.f32 %v221_v51, %v1788_v41  ;;  %v335_v55 = vadd.f32 %v334_v52, %v1790_v42  ;;  %v223_v56 = vpop.f32.mrb[11].mxu0  ;;  %v336_v57 = vpop.f32.mrb[11].mxu1  ;;  %924 = vmatmul.mubr.bf16.gmra.mrb[36].mxu1 %v457_v33  ;;  %1037 = vmatmul.mubr.bf16.gmra.mrb[36].mxu0 %v459_v34  ;;  %v405_v61 = vmax.f32 %v218_v45, 0.0 }
 0x107   :  { %v408_v58 = vmax.f32 %v333_v50, 0.0  ;;  %v224_v59 = vadd.f32 %v223_v56, %v1793_v43  ;;  %v337_v60 = vadd.f32 %v336_v57, %v1795_v44  ;;  %v406_v0 = vmax.f32 %v220_v49, 0.0 }
 0x108   :  { %v409_v62 = vmax.f32 %v222_v54, 0.0  ;;  %v411_v63 = vmax.f32 %v335_v55, 0.0 }
 0x109   :  { %v410_v2 = vmax.f32 %v224_v59, 0.0  ;;  %v412_v3 = vmax.f32 %v337_v60, 0.0 }
 0x10a   :  { %v461_v4 = vpack.c.bf16 %v409_v62, %v405_v61  ;;  %v463_v5 = vpack.c.bf16 %v411_v63, %v407_v53 }
 0x10b   :  { %v462_v6 = vpack.c.bf16 %v410_v2, %v406_v0  ;;  %v464_v7 = vpack.c.bf16 %v412_v3, %v408_v58  ;;  %v227_v8 = vpop.f32.mrb[12].mxu0  ;;  %v340_v9 = vpop.f32.mrb[12].mxu1 }
 0x10c   :  { %v228_v10 = vadd.f32 %v227_v8, %v1788_v41  ;;  %v341_v11 = vadd.f32 %v340_v9, %v1790_v42  ;;  %v229_v12 = vpop.f32.mrb[13].mxu0  ;;  %v342_v13 = vpop.f32.mrb[13].mxu1 }
 0x10d   :  { %v230_v14 = vadd.f32 %v229_v12, %v1793_v43  ;;  %v343_v15 = vadd.f32 %v342_v13, %v1795_v44  ;;  %v231_v16 = vpop.f32.mrb[14].mxu0  ;;  %v344_v17 = vpop.f32.mrb[14].mxu1  ;;  %933 = vmatprep.mubr.bf16.mxu1 %v462_v6  ;;  %1046 = vmatprep.mubr.bf16.mxu0 %v464_v7 }
 0x10e   :  { %v415_v18 = vmax.f32 %v341_v11, 0.0  ;;  %v232_v19 = vadd.f32 %v231_v16, %v1788_v41  ;;  %v345_v20 = vadd.f32 %v344_v17, %v1790_v42  ;;  %v233_v21 = vpop.f32.mrb[15].mxu0  ;;  %v346_v22 = vpop.f32.mrb[15].mxu1  ;;  %934 = vmatmul.mubr.bf16.gmra.mrb[40].mxu1 %v461_v4  ;;  %1047 = vmatmul.mubr.bf16.gmra.mrb[40].mxu0 %v463_v5  ;;  %v413_v26 = vmax.f32 %v228_v10, 0.0 }
 0x10f   :  { %v416_v23 = vmax.f32 %v343_v15, 0.0  ;;  %v234_v24 = vadd.f32 %v233_v21, %v1793_v43  ;;  %v347_v25 = vadd.f32 %v346_v22, %v1795_v44  ;;  %v414_v28 = vmax.f32 %v230_v14, 0.0 }
 0x110   :  { %v417_v1 = vmax.f32 %v232_v19, 0.0  ;;  %v419_v27 = vmax.f32 %v345_v20, 0.0 }
 0x111   :  { %v418_v29 = vmax.f32 %v234_v24, 0.0  ;;  %v420_v30 = vmax.f32 %v347_v25, 0.0 }
 0x112   :  { %v465_v31 = vpack.c.bf16 %v417_v1, %v413_v26  ;;  %v467_v32 = vpack.c.bf16 %v419_v27, %v415_v18 }
 0x113   :  { %v466_v33 = vpack.c.bf16 %v418_v29, %v414_v28  ;;  %v468_v34 = vpack.c.bf16 %v420_v30, %v416_v23  ;;  %v237_v35 = vpop.f32.mrb[16].mxu0  ;;  %v350_v37 = vpop.f32.mrb[16].mxu1 }
 0x114   :  { %v238_v38 = vadd.f32 %v237_v35, %v1788_v41  ;;  %v351_v40 = vadd.f32 %v350_v37, %v1790_v42  ;;  %v239_v45 = vpop.f32.mrb[17].mxu0  ;;  %v352_v46 = vpop.f32.mrb[17].mxu1 }
 0x115   :  { %v240_v47 = vadd.f32 %v239_v45, %v1793_v43  ;;  %v353_v48 = vadd.f32 %v352_v46, %v1795_v44  ;;  %v241_v49 = vpop.f32.mrb[18].mxu0  ;;  %v354_v50 = vpop.f32.mrb[18].mxu1  ;;  %943 = vmatprep.mubr.bf16.mxu1 %v466_v33  ;;  %1056 = vmatprep.mubr.bf16.mxu0 %v468_v34 }
 0x116   :  { %v423_v51 = vmax.f32 %v351_v40, 0.0  ;;  %v242_v52 = vadd.f32 %v241_v49, %v1788_v41  ;;  %v355_v53 = vadd.f32 %v354_v50, %v1790_v42  ;;  %v243_v54 = vpop.f32.mrb[19].mxu0  ;;  %v356_v55 = vpop.f32.mrb[19].mxu1  ;;  %944 = vmatmul.mubr.bf16.gmra.mrb[44].mxu1 %v465_v31  ;;  %1057 = vmatmul.mubr.bf16.gmra.mrb[44].mxu0 %v467_v32  ;;  %v421_v59 = vmax.f32 %v238_v38, 0.0 }
 0x117   :  { %v424_v56 = vmax.f32 %v353_v48, 0.0  ;;  %v244_v57 = vadd.f32 %v243_v54, %v1793_v43  ;;  %v357_v58 = vadd.f32 %v356_v55, %v1795_v44  ;;  %v422_v62 = vmax.f32 %v240_v47, 0.0 }
 0x118   :  { %v425_v60 = vmax.f32 %v242_v52, 0.0  ;;  %v427_v61 = vmax.f32 %v355_v53, 0.0 }
 0x119   :  { %v426_v63 = vmax.f32 %v244_v57, 0.0  ;;  %v428_v0 = vmax.f32 %v357_v58, 0.0 }
 0x11a   :  { %v469_v2 = vpack.c.bf16 %v425_v60, %v421_v59  ;;  %v471_v3 = vpack.c.bf16 %v427_v61, %v423_v51 }
 0x11b   :  { %v470_v4 = vpack.c.bf16 %v426_v63, %v422_v62  ;;  %v472_v5 = vpack.c.bf16 %v428_v0, %v424_v56  ;;  %v247_v6 = vpop.f32.mrb[20].mxu0  ;;  %v360_v7 = vpop.f32.mrb[20].mxu1 }
 0x11c   :  { %v248_v8 = vadd.f32 %v247_v6, %v1788_v41  ;;  %v361_v9 = vadd.f32 %v360_v7, %v1790_v42  ;;  %v249_v10 = vpop.f32.mrb[21].mxu0  ;;  %v362_v11 = vpop.f32.mrb[21].mxu1 }
 0x11d   :  { %v250_v12 = vadd.f32 %v249_v10, %v1793_v43  ;;  %v363_v13 = vadd.f32 %v362_v11, %v1795_v44  ;;  %v251_v14 = vpop.f32.mrb[22].mxu0  ;;  %v364_v15 = vpop.f32.mrb[22].mxu1  ;;  %953 = vmatprep.mubr.bf16.mxu1 %v470_v4  ;;  %1066 = vmatprep.mubr.bf16.mxu0 %v472_v5 }
 0x11e   :  { %v431_v16 = vmax.f32 %v361_v9, 0.0  ;;  %v252_v17 = vadd.f32 %v251_v14, %v1788_v41  ;;  %v365_v18 = vadd.f32 %v364_v15, %v1790_v42  ;;  %v253_v19 = vpop.f32.mrb[23].mxu0  ;;  %v366_v20 = vpop.f32.mrb[23].mxu1  ;;  %954 = vmatmul.mubr.bf16.gmra.mrb[48].mxu1 %v469_v2  ;;  %1067 = vmatmul.mubr.bf16.gmra.mrb[48].mxu0 %v471_v3  ;;  %v429_v24 = vmax.f32 %v248_v8, 0.0 }
 0x11f   :  { %v432_v21 = vmax.f32 %v363_v13, 0.0  ;;  %v254_v22 = vadd.f32 %v253_v19, %v1793_v43  ;;  %v367_v23 = vadd.f32 %v366_v20, %v1795_v44  ;;  %v430_v1 = vmax.f32 %v250_v12, 0.0 }
 0x120   :  { %v433_v25 = vmax.f32 %v252_v17, 0.0  ;;  %v435_v26 = vmax.f32 %v365_v18, 0.0 }
 0x121   :  { %v434_v27 = vmax.f32 %v254_v22, 0.0  ;;  %v436_v28 = vmax.f32 %v367_v23, 0.0 }
 0x122   :  { %v473_v29 = vpack.c.bf16 %v433_v25, %v429_v24  ;;  %v475_v30 = vpack.c.bf16 %v435_v26, %v431_v16 }
 0x123   :  { %v474_v31 = vpack.c.bf16 %v434_v27, %v430_v1  ;;  %v476_v32 = vpack.c.bf16 %v436_v28, %v432_v21  ;;  %v257_v33 = vpop.f32.mrb[24].mxu0  ;;  %v370_v34 = vpop.f32.mrb[24].mxu1 }
 0x124   :  { %v258_v35 = vadd.f32 %v257_v33, %v1788_v41  ;;  %v371_v37 = vadd.f32 %v370_v34, %v1790_v42  ;;  %v259_v38 = vpop.f32.mrb[25].mxu0  ;;  %v372_v40 = vpop.f32.mrb[25].mxu1 }
 0x125   :  { %v260_v45 = vadd.f32 %v259_v38, %v1793_v43  ;;  %v373_v46 = vadd.f32 %v372_v40, %v1795_v44  ;;  %v261_v47 = vpop.f32.mrb[26].mxu0  ;;  %v374_v48 = vpop.f32.mrb[26].mxu1  ;;  %963 = vmatprep.mubr.bf16.mxu1 %v474_v31  ;;  %1076 = vmatprep.mubr.bf16.mxu0 %v476_v32  ;;  %v1139_v32 = vld [vmem:[%s1960_s5] sm:$0x3] }
 0x126   :  { %v439_v49 = vmax.f32 %v371_v37, 0.0  ;;  %v262_v50 = vadd.f32 %v261_v47, %v1788_v41  ;;  %v375_v51 = vadd.f32 %v374_v48, %v1790_v42  ;;  %v263_v52 = vpop.f32.mrb[27].mxu0  ;;  %v376_v53 = vpop.f32.mrb[27].mxu1  ;;  %964 = vmatmul.mubr.bf16.gmra.mrb[52].mxu1 %v473_v29  ;;  %1077 = vmatmul.mubr.bf16.gmra.mrb[52].mxu0 %v475_v30  ;;  %v437_v57 = vmax.f32 %v258_v35, 0.0 }
 0x127   :  { %v440_v54 = vmax.f32 %v373_v46, 0.0  ;;  %v264_v55 = vadd.f32 %v263_v52, %v1793_v43  ;;  %v377_v56 = vadd.f32 %v376_v53, %v1795_v44  ;;  %v438_v60 = vmax.f32 %v260_v45, 0.0 }
 0x128   :  { %v441_v58 = vmax.f32 %v262_v50, 0.0  ;;  %v443_v59 = vmax.f32 %v375_v51, 0.0  ;;  %v1877_v47 = vrot.slane %v1139_v32, %v1780_v36  ;;  %v1881_v52 = vrot.slane %v1139_v32, %v1785_v39 }
 0x129   :  { %v442_v61 = vmax.f32 %v264_v55, 0.0  ;;  %v444_v62 = vmax.f32 %v377_v56, 0.0 }
 0x12a   :  { %v477_v63 = vpack.c.bf16 %v441_v58, %v437_v57  ;;  %v479_v0 = vpack.c.bf16 %v443_v59, %v439_v49 }
 0x12b   :  { %v478_v2 = vpack.c.bf16 %v442_v61, %v438_v60  ;;  %v480_v3 = vpack.c.bf16 %v444_v62, %v440_v54  ;;  %v267_v4 = vpop.f32.mrb[28].mxu0  ;;  %v380_v5 = vpop.f32.mrb[28].mxu1 }
 0x12c   :  { %v268_v6 = vadd.f32 %v267_v4, %v1788_v41  ;;  %v381_v7 = vadd.f32 %v380_v5, %v1790_v42  ;;  %v269_v8 = vpop.f32.mrb[29].mxu0  ;;  %v382_v9 = vpop.f32.mrb[29].mxu1 }
 0x12d   :  { %v270_v10 = vadd.f32 %v269_v8, %v1793_v43  ;;  %v383_v11 = vadd.f32 %v382_v9, %v1795_v44  ;;  %v271_v12 = vpop.f32.mrb[30].mxu0  ;;  %v384_v13 = vpop.f32.mrb[30].mxu1  ;;  %973 = vmatprep.mubr.bf16.mxu1 %v478_v2  ;;  %1086 = vmatprep.mubr.bf16.mxu0 %v480_v3 }
 0x12e   :  { %v447_v14 = vmax.f32 %v381_v7, 0.0  ;;  %v272_v15 = vadd.f32 %v271_v12, %v1788_v41  ;;  %v385_v16 = vadd.f32 %v384_v13, %v1790_v42  ;;  %v273_v17 = vpop.f32.mrb[31].mxu0  ;;  %v386_v18 = vpop.f32.mrb[31].mxu1  ;;  %974 = vmatmul.mubr.bf16.gmra.mrb[56].mxu1 %v477_v63  ;;  %1087 = vmatmul.mubr.bf16.gmra.mrb[56].mxu0 %v479_v0  ;;  %v445_v22 = vmax.f32 %v268_v6, 0.0  ;;  %v549_v42 = vld [vmem:[%s1959_s4] sm:$0x3] }
 0x12f   :  { %v448_v19 = vmax.f32 %v383_v11, 0.0  ;;  %v274_v20 = vadd.f32 %v273_v17, %v1793_v43  ;;  %v387_v21 = vadd.f32 %v386_v18, %v1795_v44  ;;  %v446_v25 = vmax.f32 %v270_v10, 0.0  ;;  %s1620_s4 = smov [#allocation6]  }
 0x130   :  { %v449_v23 = vmax.f32 %v272_v15, 0.0  ;;  %v451_v24 = vmax.f32 %v385_v16, 0.0  ;;  %v1865_v43 = vrot.slane %v549_v42, %v1780_v36  ;;  %v1868_v44 = vrot.slane %v549_v42, %v1785_v39  ;;  %s1293_s5 = sshll.u32 %s1620_s4, 4  ;;  %s1294_s5 = int_to_ptr.vmem [resolvable:$true] %s1293_s5 }
 0x131   :  { %v450_v26 = vmax.f32 %v274_v20, 0.0  ;;  %v452_v1 = vmax.f32 %v387_v21, 0.0  ;;  %s1590_s16 = scalar_lea.vmem %s1294_s5, 16  ;;  %s1594_s17 = scalar_lea.vmem %s1294_s5, 32 }
 0x132   :  { %v481_v27 = vpack.c.bf16 %v449_v23, %v445_v22  ;;  %v483_v28 = vpack.c.bf16 %v451_v24, %v447_v14  ;;  %p1591_p8 = scmp.ne.s32.totalorder %s1294_s5, %s1590_s16  ;;  %p1595_p9 = scmp.lt.s32.totalorder %s1294_s5, %s1294_s5 }
 0x133   :  { %v482_v41 = vpack.c.bf16 %v450_v26, %v446_v25  ;;  %v484_v29 = vpack.c.bf16 %v452_v1, %v448_v19  ;;  %p1596_p10 = scmp.lt.s32.totalorder %s1594_s17, %s1590_s16 }
 0x135   :  { %983 = vmatprep.mubr.bf16.mxu1 %v482_v41  ;;  %1096 = vmatprep.mubr.bf16.mxu0 %v484_v29  ;;  %p1597_p11 = por %p1596_p10, %p1595_p9 }
 0x136   :  { %984 = vmatmul.mubr.bf16.gmra.mrb[60].mxu1 %v481_v27  ;;  %1097 = vmatmul.mubr.bf16.gmra.mrb[60].mxu0 %v483_v28 }
 0x137   :  { %p1598_p12 = pnand %p1597_p11, %p1591_p8 }
 0x1d1   :  { %v915_v30 = vpop.f32.mrb[32].mxu1  ;;  %v1028_v31 = vpop.f32.mrb[32].mxu0 }
 0x1d2   :  { %v916_v33 = vadd.f32 %v915_v30, %v1865_v43  ;;  %v917_v34 = vpop.f32.mrb[33].mxu1  ;;  %v1030_v35 = vpop.f32.mrb[33].mxu0 }
 0x1d3   :  { %v918_v37 = vadd.f32 %v917_v34, %v1868_v44  ;;  %v919_v38 = vpop.f32.mrb[34].mxu1  ;;  %v1032_v40 = vpop.f32.mrb[34].mxu0 }
 0x1d4   :  { %v1029_v45 = vadd.f32 %v1028_v31, %v916_v33  ;;  %v920_v46 = vadd.f32 %v919_v38, %v1865_v43  ;;  %v921_v48 = vpop.f32.mrb[35].mxu1  ;;  %v1034_v49 = vpop.f32.mrb[35].mxu0 }
 0x1d5   :  { %v1031_v50 = vadd.f32 %v1030_v35, %v918_v37  ;;  %v922_v51 = vadd.f32 %v921_v48, %v1868_v44 }
 0x1d6   :  { %v1107_v53 = vmax.f32 %v1029_v45, 0.0  ;;  %v1033_v54 = vadd.f32 %v1032_v40, %v920_v46 }
 0x1d7   :  { %v1108_v55 = vmax.f32 %v1031_v50, 0.0  ;;  %v1035_v56 = vadd.f32 %v1034_v49, %v922_v51 }
 0x1d8   :  { %v1109_v57 = vmax.f32 %v1033_v54, 0.0  ;;  %v1151_v58 = vmul.f32 %v1877_v47, %v1107_v53 }
 0x1d9   :  { %v1110_v59 = vmax.f32 %v1035_v56, 0.0  ;;  %v925_v60 = vpop.f32.mrb[36].mxu1  ;;  %v1038_v61 = vpop.f32.mrb[36].mxu0  ;;  %v1152_v36 = vmul.f32 %v1881_v52, %v1108_v55 }
 0x1da   :  { %v1153_v62 = vmul.f32 %v1877_v47, %v1109_v57  ;;  %v926_v63 = vadd.f32 %v925_v60, %v1865_v43  ;;  %v927_v0 = vpop.f32.mrb[37].mxu1  ;;  %v1040_v2 = vpop.f32.mrb[37].mxu0 }
 0x1db   :  { %v1154_v39 = vmul.f32 %v1881_v52, %v1110_v59  ;;  %v928_v3 = vadd.f32 %v927_v0, %v1868_v44  ;;  %v929_v4 = vpop.f32.mrb[38].mxu1  ;;  %v1042_v5 = vpop.f32.mrb[38].mxu0  ;;  %v1183_v6 = vadd.f32 %v1152_v36, %v1151_v58 }
 0x1dc   :  { %v1039_v7 = vadd.f32 %v1038_v61, %v926_v63  ;;  %v930_v8 = vadd.f32 %v929_v4, %v1865_v43  ;;  %v931_v9 = vpop.f32.mrb[39].mxu1  ;;  %v1044_v10 = vpop.f32.mrb[39].mxu0 }
 0x1dd   :  { %v1041_v11 = vadd.f32 %v1040_v2, %v928_v3  ;;  %v932_v12 = vadd.f32 %v931_v9, %v1868_v44  ;;  %1184 = vadd.xlane.f32.xlu0 %v1183_v6  ;;  %v1186_v13 = vadd.f32 %v1154_v39, %v1153_v62 }
 0x1de   :  { %v1111_v14 = vmax.f32 %v1039_v7, 0.0  ;;  %v1043_v15 = vadd.f32 %v1042_v5, %v930_v8 }
 0x1df   :  { %v1112_v16 = vmax.f32 %v1041_v11, 0.0  ;;  %v1045_v17 = vadd.f32 %v1044_v10, %v932_v12 }
 0x1e0   :  { %v1113_v18 = vmax.f32 %v1043_v15, 0.0  ;;  %v1155_v19 = vmul.f32 %v1877_v47, %v1111_v14 }
 0x1e1   :  { %v1114_v20 = vmax.f32 %v1045_v17, 0.0  ;;  %v935_v21 = vpop.f32.mrb[40].mxu1  ;;  %v1048_v22 = vpop.f32.mrb[40].mxu0  ;;  %1187 = vadd.xlane.f32.xlu0 %v1186_v13  ;;  %v1156_v23 = vmul.f32 %v1881_v52, %v1112_v16 }
 0x1e2   :  { %v1157_v24 = vmul.f32 %v1877_v47, %v1113_v18  ;;  %v936_v25 = vadd.f32 %v935_v21, %v1865_v43  ;;  %v937_v26 = vpop.f32.mrb[41].mxu1  ;;  %v1050_v1 = vpop.f32.mrb[41].mxu0 }
 0x1e3   :  { %v1158_v27 = vmul.f32 %v1881_v52, %v1114_v20  ;;  %v938_v28 = vadd.f32 %v937_v26, %v1868_v44  ;;  %v939_v41 = vpop.f32.mrb[42].mxu1  ;;  %v1052_v29 = vpop.f32.mrb[42].mxu0  ;;  %v1189_v42 = vadd.f32 %v1156_v23, %v1155_v19 }
 0x1e4   :  { %v1049_v30 = vadd.f32 %v1048_v22, %v936_v25  ;;  %v940_v31 = vadd.f32 %v939_v41, %v1865_v43  ;;  %v941_v32 = vpop.f32.mrb[43].mxu1  ;;  %v1054_v33 = vpop.f32.mrb[43].mxu0 }
 0x1e5   :  { %v1051_v34 = vadd.f32 %v1050_v1, %v938_v28  ;;  %v942_v35 = vadd.f32 %v941_v32, %v1868_v44  ;;  %1190 = vadd.xlane.f32.xlu1 %v1189_v42  ;;  %v1192_v37 = vadd.f32 %v1158_v27, %v1157_v24 }
 0x1e6   :  { %v1115_v38 = vmax.f32 %v1049_v30, 0.0  ;;  %v1053_v40 = vadd.f32 %v1052_v29, %v940_v31 }
 0x1e7   :  { %v1116_v45 = vmax.f32 %v1051_v34, 0.0  ;;  %v1055_v46 = vadd.f32 %v1054_v33, %v942_v35 }
 0x1e8   :  { %v1159_v48 = vmul.f32 %v1877_v47, %v1115_v38  ;;  %v1117_v49 = vmax.f32 %v1053_v40, 0.0 }
 0x1e9   :  { %v1160_v50 = vmul.f32 %v1881_v52, %v1116_v45  ;;  %v1118_v51 = vmax.f32 %v1055_v46, 0.0  ;;  %v945_v53 = vpop.f32.mrb[44].mxu1  ;;  %v1058_v54 = vpop.f32.mrb[44].mxu0  ;;  %1193 = vadd.xlane.f32.xlu1 %v1192_v37 }
 0x1ea   :  { %v1161_v55 = vmul.f32 %v1877_v47, %v1117_v49  ;;  %v946_v56 = vadd.f32 %v945_v53, %v1865_v43  ;;  %v947_v57 = vpop.f32.mrb[45].mxu1  ;;  %v1060_v58 = vpop.f32.mrb[45].mxu0 }
 0x1eb   :  { %v1162_v59 = vmul.f32 %v1881_v52, %v1118_v51  ;;  %v948_v60 = vadd.f32 %v947_v57, %v1868_v44  ;;  %v949_v61 = vpop.f32.mrb[46].mxu1  ;;  %v1062_v36 = vpop.f32.mrb[46].mxu0  ;;  %v1195_v62 = vadd.f32 %v1160_v50, %v1159_v48 }
 0x1ec   :  { %v1059_v63 = vadd.f32 %v1058_v54, %v946_v56  ;;  %v950_v0 = vadd.f32 %v949_v61, %v1865_v43  ;;  %v951_v2 = vpop.f32.mrb[47].mxu1  ;;  %v1064_v39 = vpop.f32.mrb[47].mxu0 }
 0x1ed   :  { %v1061_v3 = vadd.f32 %v1060_v58, %v948_v60  ;;  %v952_v4 = vadd.f32 %v951_v2, %v1868_v44  ;;  %1196 = vadd.xlane.f32.xlu0 %v1195_v62  ;;  %v1198_v5 = vadd.f32 %v1162_v59, %v1161_v55 }
 0x1ee   :  { %v1119_v6 = vmax.f32 %v1059_v63, 0.0  ;;  %v1063_v7 = vadd.f32 %v1062_v36, %v950_v0 }
 0x1ef   :  { %v1120_v8 = vmax.f32 %v1061_v3, 0.0  ;;  %v1065_v9 = vadd.f32 %v1064_v39, %v952_v4  ;;  %1199 = vadd.xlane.f32.xlu1 %v1198_v5 }
 0x1f0   :  { %v1163_v10 = vmul.f32 %v1877_v47, %v1119_v6  ;;  %v1121_v11 = vmax.f32 %v1063_v7, 0.0 }
 0x1f1   :  { %v1164_v12 = vmul.f32 %v1881_v52, %v1120_v8  ;;  %v1122_v13 = vmax.f32 %v1065_v9, 0.0  ;;  %v955_v14 = vpop.f32.mrb[48].mxu1  ;;  %v1068_v15 = vpop.f32.mrb[48].mxu0 }
 0x1f2   :  { %v1165_v16 = vmul.f32 %v1877_v47, %v1121_v11  ;;  %v956_v17 = vadd.f32 %v955_v14, %v1865_v43  ;;  %v957_v18 = vpop.f32.mrb[49].mxu1  ;;  %v1070_v19 = vpop.f32.mrb[49].mxu0 }
 0x1f3   :  { %v1166_v20 = vmul.f32 %v1881_v52, %v1122_v13  ;;  %v958_v21 = vadd.f32 %v957_v18, %v1868_v44  ;;  %v959_v22 = vpop.f32.mrb[50].mxu1  ;;  %v1072_v23 = vpop.f32.mrb[50].mxu0  ;;  %v1201_v24 = vadd.f32 %v1164_v12, %v1163_v10 }
 0x1f4   :  { %v1069_v25 = vadd.f32 %v1068_v15, %v956_v17  ;;  %v960_v26 = vadd.f32 %v959_v22, %v1865_v43  ;;  %v961_v1 = vpop.f32.mrb[51].mxu1  ;;  %v1074_v27 = vpop.f32.mrb[51].mxu0 }
 0x1f5   :  { %v1071_v28 = vadd.f32 %v1070_v19, %v958_v21  ;;  %v962_v41 = vadd.f32 %v961_v1, %v1868_v44  ;;  %1202 = vadd.xlane.f32.xlu0 %v1201_v24  ;;  %v1204_v29 = vadd.f32 %v1166_v20, %v1165_v16 }
 0x1f6   :  { %v1123_v42 = vmax.f32 %v1069_v25, 0.0  ;;  %v1073_v30 = vadd.f32 %v1072_v23, %v960_v26 }
 0x1f7   :  { %v1124_v31 = vmax.f32 %v1071_v28, 0.0  ;;  %v1075_v32 = vadd.f32 %v1074_v27, %v962_v41  ;;  %1205 = vadd.xlane.f32.xlu1 %v1204_v29 }
 0x1f8   :  { %v1167_v33 = vmul.f32 %v1877_v47, %v1123_v42  ;;  %v1125_v34 = vmax.f32 %v1073_v30, 0.0 }
 0x1f9   :  { %v1168_v35 = vmul.f32 %v1881_v52, %v1124_v31  ;;  %v1126_v37 = vmax.f32 %v1075_v32, 0.0  ;;  %v965_v38 = vpop.f32.mrb[52].mxu1  ;;  %v1078_v40 = vpop.f32.mrb[52].mxu0 }
 0x1fa   :  { %v1169_v45 = vmul.f32 %v1877_v47, %v1125_v34  ;;  %v966_v46 = vadd.f32 %v965_v38, %v1865_v43  ;;  %v967_v48 = vpop.f32.mrb[53].mxu1  ;;  %v1080_v49 = vpop.f32.mrb[53].mxu0 }
 0x1fb   :  { %v1170_v50 = vmul.f32 %v1881_v52, %v1126_v37  ;;  %v968_v51 = vadd.f32 %v967_v48, %v1868_v44  ;;  %v969_v53 = vpop.f32.mrb[54].mxu1  ;;  %v1082_v54 = vpop.f32.mrb[54].mxu0  ;;  %v1207_v55 = vadd.f32 %v1168_v35, %v1167_v33 }
 0x1fc   :  { %v1079_v56 = vadd.f32 %v1078_v40, %v966_v46  ;;  %v970_v57 = vadd.f32 %v969_v53, %v1865_v43  ;;  %v971_v58 = vpop.f32.mrb[55].mxu1  ;;  %v1084_v59 = vpop.f32.mrb[55].mxu0 }
 0x1fd   :  { %v1081_v60 = vadd.f32 %v1080_v49, %v968_v51  ;;  %v972_v61 = vadd.f32 %v971_v58, %v1868_v44  ;;  %1208 = vadd.xlane.f32.xlu0 %v1207_v55  ;;  %v1210_v36 = vadd.f32 %v1170_v50, %v1169_v45 }
 0x1fe   :  { %v1127_v62 = vmax.f32 %v1079_v56, 0.0  ;;  %v1083_v63 = vadd.f32 %v1082_v54, %v970_v57 }
 0x1ff   :  { %v1128_v0 = vmax.f32 %v1081_v60, 0.0  ;;  %v1085_v2 = vadd.f32 %v1084_v59, %v972_v61  ;;  %1211 = vadd.xlane.f32.xlu1 %v1210_v36 }
 0x200   :  { %v1171_v39 = vmul.f32 %v1877_v47, %v1127_v62  ;;  %v1129_v3 = vmax.f32 %v1083_v63, 0.0 }
 0x201   :  { %v1172_v4 = vmul.f32 %v1881_v52, %v1128_v0  ;;  %v1130_v5 = vmax.f32 %v1085_v2, 0.0  ;;  %v975_v6 = vpop.f32.mrb[56].mxu1  ;;  %v1088_v7 = vpop.f32.mrb[56].mxu0  ;;  %v1390_v0 = vld [vmem:[#allocation2] ss:$0 sm:$0xff] }
 0x202   :  { %v1173_v8 = vmul.f32 %v1877_v47, %v1129_v3  ;;  %v976_v9 = vadd.f32 %v975_v6, %v1865_v43  ;;  %v977_v10 = vpop.f32.mrb[57].mxu1  ;;  %v1090_v11 = vpop.f32.mrb[57].mxu0 }
 0x203   :  { %v1174_v12 = vmul.f32 %v1881_v52, %v1130_v5  ;;  %v978_v13 = vadd.f32 %v977_v10, %v1868_v44  ;;  %v979_v14 = vpop.f32.mrb[58].mxu1  ;;  %v1092_v15 = vpop.f32.mrb[58].mxu0  ;;  %v1213_v16 = vadd.f32 %v1172_v4, %v1171_v39 }
 0x204   :  { %v1089_v17 = vadd.f32 %v1088_v7, %v976_v9  ;;  %v980_v18 = vadd.f32 %v979_v14, %v1865_v43  ;;  %v981_v19 = vpop.f32.mrb[59].mxu1  ;;  %v1094_v20 = vpop.f32.mrb[59].mxu0 }
 0x205   :  { %v1091_v21 = vadd.f32 %v1090_v11, %v978_v13  ;;  %v982_v22 = vadd.f32 %v981_v19, %v1868_v44  ;;  %1214 = vadd.xlane.f32.xlu0 %v1213_v16  ;;  %v1216_v23 = vadd.f32 %v1174_v12, %v1173_v8 }
 0x206   :  { %v1131_v24 = vmax.f32 %v1089_v17, 0.0  ;;  %v1093_v25 = vadd.f32 %v1092_v15, %v980_v18 }
 0x207   :  { %v1132_v26 = vmax.f32 %v1091_v21, 0.0  ;;  %v1095_v1 = vadd.f32 %v1094_v20, %v982_v22  ;;  %1217 = vadd.xlane.f32.xlu1 %v1216_v23 }
 0x208   :  { %v1175_v27 = vmul.f32 %v1877_v47, %v1131_v24  ;;  %v1133_v28 = vmax.f32 %v1093_v25, 0.0 }
 0x209   :  { %v1176_v41 = vmul.f32 %v1881_v52, %v1132_v26  ;;  %v1134_v29 = vmax.f32 %v1095_v1, 0.0  ;;  %v985_v42 = vpop.f32.mrb[60].mxu1  ;;  %v1098_v30 = vpop.f32.mrb[60].mxu0 }
 0x20a   :  { %v1177_v31 = vmul.f32 %v1877_v47, %v1133_v28  ;;  %v986_v32 = vadd.f32 %v985_v42, %v1865_v43  ;;  %v987_v33 = vpop.f32.mrb[61].mxu1  ;;  %v1100_v34 = vpop.f32.mrb[61].mxu0 }
 0x20b   :  { %v1178_v35 = vmul.f32 %v1881_v52, %v1134_v29  ;;  %v988_v37 = vadd.f32 %v987_v33, %v1868_v44  ;;  %v989_v38 = vpop.f32.mrb[62].mxu1  ;;  %v1102_v40 = vpop.f32.mrb[62].mxu0  ;;  %v1219_v45 = vadd.f32 %v1176_v41, %v1175_v27 }
 0x20c   :  { %v1099_v46 = vadd.f32 %v1098_v30, %v986_v32  ;;  %v990_v48 = vadd.f32 %v989_v38, %v1865_v43  ;;  %v991_v49 = vpop.f32.mrb[63].mxu1  ;;  %v1104_v50 = vpop.f32.mrb[63].mxu0 }
 0x20d   :  { %v1101_v51 = vadd.f32 %v1100_v34, %v988_v37  ;;  %v992_v53 = vadd.f32 %v991_v49, %v1868_v44  ;;  %1220 = vadd.xlane.f32.xlu0 %v1219_v45  ;;  %v1222_v54 = vadd.f32 %v1178_v35, %v1177_v31 }
 0x20e   :  { %v1135_v55 = vmax.f32 %v1099_v46, 0.0  ;;  %v1103_v56 = vadd.f32 %v1102_v40, %v990_v48 }
 0x20f   :  { %v1136_v57 = vmax.f32 %v1101_v51, 0.0  ;;  %v1105_v58 = vadd.f32 %v1104_v50, %v992_v53  ;;  %1223 = vadd.xlane.f32.xlu1 %v1222_v54 }
 0x210   :  { %v1179_v59 = vmul.f32 %v1877_v47, %v1135_v55  ;;  %v1137_v60 = vmax.f32 %v1103_v56, 0.0 }
 0x211   :  { %v1180_v61 = vmul.f32 %v1881_v52, %v1136_v57  ;;  %v1138_v36 = vmax.f32 %v1105_v58, 0.0 }
 0x212   :  { %v1181_v43 = vmul.f32 %v1877_v47, %v1137_v60 }
 0x213   :  { %v1182_v62 = vmul.f32 %v1881_v52, %v1138_v36  ;;  %v1225_v63 = vadd.f32 %v1180_v61, %v1179_v59 }
 0x215   :  { %1226 = vadd.xlane.f32.xlu0 %v1225_v63  ;;  %v1228_v44 = vadd.f32 %v1182_v62, %v1181_v43 }
 0x217   :  { %1229 = vadd.xlane.f32.xlu1 %v1228_v44 }
 0x26a   :  { %v1185_v2 = vpop.xlane.xlu0 %1184 }
 0x26b   :  { %v1238_v39 = vadd.f32 %v1390_v0, %v1185_v2 }
 0x26d   :  { %1254 = vxpose.xlu0.b32.start [1/16] (narrow) %v1238_v39, 8 }
 0x26e   :  { %v1188_v3 = vpop.xlane.xlu0 %1187 }
 0x26f   :  { %v1239_v4 = vadd.f32 %v1390_v0, %v1188_v3 }
 0x271   :  { %1255 = vxpose.xlu0.b32.cont [2/16] (narrow) %v1239_v4, 8 }
 0x272   :  { %v1191_v5 = vpop.xlane.xlu1 %1190 }
 0x273   :  { %v1240_v6 = vadd.f32 %v1390_v0, %v1191_v5 }
 0x275   :  { %1256 = vxpose.xlu0.b32.cont [3/16] (narrow) %v1240_v6, 8 }
 0x276   :  { %v1194_v7 = vpop.xlane.xlu1 %1193 }
 0x277   :  { %v1241_v8 = vadd.f32 %v1390_v0, %v1194_v7 }
 0x279   :  { %1257 = vxpose.xlu0.b32.cont [4/16] (narrow) %v1241_v8, 8 }
 0x27a   :  { %v1197_v47 = vpop.xlane.xlu0 %1196 }
 0x27b   :  { %v1242_v9 = vadd.f32 %v1390_v0, %v1197_v47 }
 0x27c   :  { %v1200_v52 = vpop.xlane.xlu1 %1199 }
 0x27d   :  { %1258 = vxpose.xlu0.b32.cont [5/16] (narrow) %v1242_v9, 8  ;;  %v1243_v10 = vadd.f32 %v1390_v0, %v1200_v52 }
 0x281   :  { %1259 = vxpose.xlu0.b32.cont [6/16] (narrow) %v1243_v10, 8 }
 0x282   :  { %v1203_v11 = vpop.xlane.xlu0 %1202 }
 0x283   :  { %v1244_v12 = vadd.f32 %v1390_v0, %v1203_v11 }
 0x284   :  { %v1206_v13 = vpop.xlane.xlu1 %1205 }
 0x285   :  { %1260 = vxpose.xlu0.b32.cont [7/16] (narrow) %v1244_v12, 8  ;;  %v1245_v14 = vadd.f32 %v1390_v0, %v1206_v13 }
 0x289   :  { %1261 = vxpose.xlu0.b32.cont [8/16] (narrow) %v1245_v14, 8 }
 0x28a   :  { %v1209_v15 = vpop.xlane.xlu0 %1208 }
 0x28b   :  { %v1246_v16 = vadd.f32 %v1390_v0, %v1209_v15 }
 0x28c   :  { %v1212_v17 = vpop.xlane.xlu1 %1211 }
 0x28d   :  { %1262 = vxpose.xlu0.b32.cont [9/16] (narrow) %v1246_v16, 8  ;;  %v1247_v18 = vadd.f32 %v1390_v0, %v1212_v17 }
 0x291   :  { %1263 = vxpose.xlu0.b32.cont [10/16] (narrow) %v1247_v18, 8 }
 0x292   :  { %v1215_v19 = vpop.xlane.xlu0 %1214 }
 0x293   :  { %v1248_v20 = vadd.f32 %v1390_v0, %v1215_v19 }
 0x294   :  { %v1218_v21 = vpop.xlane.xlu1 %1217 }
 0x295   :  { %1264 = vxpose.xlu0.b32.cont [11/16] (narrow) %v1248_v20, 8  ;;  %v1249_v22 = vadd.f32 %v1390_v0, %v1218_v21 }
 0x299   :  { %1265 = vxpose.xlu0.b32.cont [12/16] (narrow) %v1249_v22, 8 }
 0x29a   :  { %v1221_v23 = vpop.xlane.xlu0 %1220 }
 0x29b   :  { %v1250_v24 = vadd.f32 %v1390_v0, %v1221_v23 }
 0x29c   :  { %v1224_v25 = vpop.xlane.xlu1 %1223 }
 0x29d   :  { %1266 = vxpose.xlu0.b32.cont [13/16] (narrow) %v1250_v24, 8  ;;  %v1251_v26 = vadd.f32 %v1390_v0, %v1224_v25 }
 0x2a1   :  { %1267 = vxpose.xlu0.b32.cont [14/16] (narrow) %v1251_v26, 8 }
 0x2a2   :  { %v1227_v1 = vpop.xlane.xlu0 %1226 }
 0x2a3   :  { %v1252_v27 = vadd.f32 %v1390_v0, %v1227_v1 }
 0x2a4   :  { %v1230_v28 = vpop.xlane.xlu1 %1229 }
 0x2a5   :  { %1268 = vxpose.xlu0.b32.cont [15/16] (narrow) %v1252_v27, 8  ;;  %v1253_v41 = vadd.f32 %v1390_v0, %v1230_v28 }
 0x2a9   :  { %1269 = vxpose.xlu0.b32.end [16/16] (narrow) %v1253_v41, 8 }
 0x2ed   :  { %v1270_v29 = vpop.trf.xlu0 }
 0x2ee   :  { %1286 = vst [vmem:[#allocation6] sm:$0x1] %v1270_v29 }
 0x2ef   :  { %1601 = shalt.err (!%p1598_p12)
}
 0x2f0   :  { %s1602_s20 = scalar_lea.hbm %s1962_s7, 16 }
 0x2f1   :  { %p1603_p13 = scmp.ne.s32.totalorder %s1962_s7, %s1602_s20  ;;  %p1606_p0 = scmp.lt.u32.totalorder %s1602_s20, %s1962_s7 }
 0x2f3   :  { %p1608_p1 = pnand %p1606_p0, %p1603_p13 }
 0x2f5   :  { %1611 = shalt.err (!%p1608_p1)
}
 0x2f6   :  { %1296 = dma.vmem_to_hbm [thread:$0]  %s1294_s5, 16, %s1962_s7, [#allocation5]  }
 0x2f7   :  { %1614 = dma.done.wait [#allocation5], 16  }
 0x2f8   :  { %1615 = vsyncadd [#allocation5], 4294967280 }
 0x2f9   :  { %1300 = vsyncpa [#allocation4], 1 }
 0x2fa   :  { %1301 = vsyncpa [#allocation5], 1 }

</bundles_post_ra>
